<compile_context>
chip_gen: v6e
topology: v6e:2x2x1
jax: 0.10.0
libtpu: 0.0.40
codegen_flags: <defaults>
</compile_context>

<pallas_src>
import functools

import jax
import jax.numpy as jnp
from jax import lax
from jax.experimental import pallas as pl
from jax.experimental.pallas import tpu as pltpu


_LANE = 128
_SUBLANE = {4: 8, 2: 16, 1: 32}      # sublane alignment by dtype itemsize
_MIN_ROW_STEPS = 8                   # target row-tile count (megacore + pipeline)
_MAX_TILE_HW = 64 * _LANE            # spatial tile cap when H*W itself is tiled
                                     # (bounds the unrolled in-kernel lane fold)


def _round_up(x, m):
    return ((x + m - 1) // m) * m


def _round_down(x, m):
    return (x // m) * m


def _vmem_budgets():
    """(block_budget_bytes, vmem_limit_bytes) for the current TPU generation."""
    try:
        phys = int(pltpu.get_tpu_info().vmem_capacity_bytes)
    except Exception:  # conservative fallback: size for v7x (64 MiB per TC)
        phys = 64 * 1024 * 1024
    if phys >= 128 * 1024 * 1024:          # v5e / v6e: 128 MiB physical VMEM
        return 48 * 1024 * 1024, 80 * 1024 * 1024
    # v7x: 64 MiB physical VMEM per TensorCore -> stay well inside it.
    return 22 * 1024 * 1024, 44 * 1024 * 1024


def _row_steps_cap(rows, sub, in_row_bytes):
    """Largest row-tile size that still leaves enough grid steps.

    Prefer >= _MIN_ROW_STEPS row tiles (v7x megacore sharding + DMA pipeline),
    but never shrink the input block below ~1 MiB for it; fall back to >= 2
    tiles unless even that would drop blocks under ~256 KiB.
    """
    for steps, block_floor in ((_MIN_ROW_STEPS, 1 << 20), (2, 256 << 10)):
        cap = _round_up(pl.cdiv(rows, steps), sub)
        if cap * in_row_bytes >= block_floor:
            return cap
    return _round_up(rows, sub)


def _choose_tiles(rows, hw, itemsize):
    """Pick (tile_r, tile_hw, vmem_limit) with padding-aware byte accounting."""
    block_budget, vmem_limit = _vmem_budgets()
    sub = _SUBLANE.get(itemsize, 8)
    hw_pad = _round_up(hw, _LANE)

    # Per-row VMEM cost of one grid step: double-buffered lane-padded input
    # block + double-buffered 128-lane-padded (tile_r, 1) output block
    # (+ the f32 accumulator when H*W is tiled).
    out_row = 2 * _LANE * itemsize
    single_row = 2 * hw_pad * itemsize + out_row

    if single_row * sub <= block_budget:
        # Common case: full spatial extent in one block; tile rows only.
        tile_hw = hw
        byte_cap = _round_down(block_budget // single_row, sub)
        steps_cap = _row_steps_cap(rows, sub, hw_pad * itemsize)
    else:
        # Very large H*W: tile the spatial (reduction) axis too, with an f32
        # (tile_r, 128) accumulator resident across it.
        tile_hw = min(hw_pad, _MAX_TILE_HW)
        tiled_row = 2 * tile_hw * itemsize + out_row + _LANE * 4
        byte_cap = _round_down(block_budget // tiled_row, sub)
        steps_cap = _row_steps_cap(rows, sub, tile_hw * itemsize)

    tile_r = max(sub, min(byte_cap, steps_cap))
    if tile_r >= rows:
        tile_r = rows  # full-extent block along rows (always layout-legal)
    return tile_r, tile_hw, vmem_limit


def _gap_kernel_single(x_ref, o_ref, *, inv_hw):
    # Full H*W per block: load, widen to f32, lane-reduce, scale, store.
    x = x_ref[...].astype(jnp.float32)
    o_ref[...] = (jnp.sum(x, axis=-1, keepdims=True) * inv_hw).astype(o_ref.dtype)


def _fold_to_lanes(x, tile_hw):
    # (tile_r, tile_hw) -> (tile_r, 128) with pure element-wise (VPU) adds.
    # tile_hw is a multiple of 128; static lane-aligned slices are free.
    acc = x[:, 0:_LANE]
    for j in range(1, tile_hw // _LANE):
        acc = acc + x[:, j * _LANE:(j + 1) * _LANE]
    return acc


def _gap_kernel_tiled(x_ref, o_ref, acc_ref, *, hw, tile_hw, num_hw_tiles, inv_hw):
    # Grid = (row_tiles, hw_tiles); hw (reduction) axis is last / "arbitrary".
    k = pl.program_id(1)

    @pl.when(k == 0)
    def _():
        acc_ref[...] = jnp.zeros_like(acc_ref)

    x = x_ref[...].astype(jnp.float32)
    tail_cols = hw - (num_hw_tiles - 1) * tile_hw  # valid cols in the last tile

    if tail_cols < tile_hw:
        # Only the last spatial tile reads past H*W: mask it there (iota built
        # at (1, tile_hw)), and keep the hot path for all other k mask-free.
        @pl.when(k == num_hw_tiles - 1)
        def _():
            col = lax.broadcasted_iota(jnp.int32, (1, tile_hw), 1)
            acc_ref[...] += _fold_to_lanes(jnp.where(col < tail_cols, x, 0.0), tile_hw)

        @pl.when(k < num_hw_tiles - 1)
        def _():
            acc_ref[...] += _fold_to_lanes(x, tile_hw)
    else:
        acc_ref[...] += _fold_to_lanes(x, tile_hw)

    @pl.when(k == num_hw_tiles - 1)
    def _():
        # One XLU cross-lane reduce + immediate-reciprocal scale, once per row
        # tile; divide by the *true* H*W regardless of tiling.
        s = jnp.sum(acc_ref[...], axis=-1, keepdims=True)
        o_ref[...] = (s * inv_hw).astype(o_ref.dtype)


def global_pool_nd(x, flatten=True, *, _tile_override=None):
    """Forward of _GlobalPoolNd with pool = global average pool.

    x: NCHW array (N, C, H, W)  ->  (N, C) if flatten else (N, C, 1, 1)
    """
    n, c, h, w = x.shape
    rows = n * c
    hw = h * w
    x2d = x.reshape(rows, hw)  # glue: collapse batch*channel, spatial on lanes

    if _tile_override is None:
        tile_r, tile_hw, vmem_limit = _choose_tiles(rows, hw, x2d.dtype.itemsize)
    else:
        tile_r, tile_hw = _tile_override
        vmem_limit = _vmem_budgets()[1]

    row_tiles = pl.cdiv(rows, tile_r)
    out_shape = jax.ShapeDtypeStruct((rows, 1), x.dtype)
    inv_hw = 1.0 / hw

    if tile_hw >= hw:
        # Full spatial extent per block: no accumulator, no masks, no epilogue.
        pooled = pl.pallas_call(
            functools.partial(_gap_kernel_single, inv_hw=inv_hw),
            out_shape=out_shape,
            grid=(row_tiles,),
            in_specs=[pl.BlockSpec((tile_r, hw), lambda i: (i, 0))],
            out_specs=pl.BlockSpec((tile_r, 1), lambda i: (i, 0)),
            compiler_params=pltpu.CompilerParams(
                dimension_semantics=("parallel",),
                vmem_limit_bytes=vmem_limit,
            ),
        )(x2d)
    else:
        assert tile_hw % _LANE == 0, "spatial tiles must be lane-aligned"
        num_hw_tiles = pl.cdiv(hw, tile_hw)
        pooled = pl.pallas_call(
            functools.partial(
                _gap_kernel_tiled, hw=hw, tile_hw=tile_hw,
                num_hw_tiles=num_hw_tiles, inv_hw=inv_hw),
            out_shape=out_shape,
            grid=(row_tiles, num_hw_tiles),
            in_specs=[pl.BlockSpec((tile_r, tile_hw), lambda i, k: (i, k))],
            out_specs=pl.BlockSpec((tile_r, 1), lambda i, k: (i, 0)),
            scratch_shapes=[pltpu.VMEM((tile_r, _LANE), jnp.float32)],
            compiler_params=pltpu.CompilerParams(
                dimension_semantics=("parallel", "arbitrary"),
                vmem_limit_bytes=vmem_limit,
            ),
        )(x2d)

    if flatten:
        # input.view(-1, size_0) with size_0 = C
        return pooled.reshape(-1, c)
    return pooled.reshape(n, c, 1, 1)


if __name__ == "__main__":
    key = jax.random.PRNGKey(0)
    x = jax.random.normal(key, (2, 4, 16, 16), dtype=jnp.float32)

    # flatten=True path (default _GlobalPoolNd forward).
    out = jax.block_until_ready(global_pool_nd(x, flatten=True))
    ref = jnp.mean(x, axis=(2, 3)).reshape(-1, x.shape[1])
    assert out.shape == (2, 4), out.shape
    assert jnp.allclose(out, ref, atol=1e-5, rtol=1e-5)

    # flatten=False path.
    out_nf = jax.block_until_ready(global_pool_nd(x, flatten=False))
    assert out_nf.shape == (2, 4, 1, 1), out_nf.shape
    assert jnp.allclose(out_nf[..., 0, 0], jnp.mean(x, axis=(2, 3)),
                        atol=1e-5, rtol=1e-5)

    # Exercise the split-H*W accumulator + tail-mask path at a small shape
    # (hw=225 not a multiple of the forced 128-wide spatial tile).
    x2 = jax.random.normal(jax.random.PRNGKey(1), (2, 4, 15, 15), dtype=jnp.float32)
    out2 = jax.block_until_ready(
        global_pool_nd(x2, flatten=True, _tile_override=(8, 128)))
    ref2 = jnp.mean(x2, axis=(2, 3)).reshape(-1, x2.shape[1])
    assert jnp.allclose(out2, ref2, atol=1e-5, rtol=1e-5)

    # bf16 input stays bf16 over HBM; accumulation is f32 inside the kernel.
    xb = jax.random.normal(jax.random.PRNGKey(2), (2, 4, 16, 16), dtype=jnp.bfloat16)
    outb = jax.block_until_ready(global_pool_nd(xb, flatten=True))
    refb = jnp.mean(xb.astype(jnp.float32), axis=(2, 3)).reshape(-1, 4).astype(jnp.bfloat16)
    assert outb.shape == (2, 4), outb.shape
    assert jnp.allclose(outb.astype(jnp.float32), refb.astype(jnp.float32),
                        atol=2e-2, rtol=2e-2)

    print("KERNEL_OK")
</pallas_src>

<mosaic_0001>
module attributes {stable_mosaic.version = 11 : i64} {
  func.func @_gap_kernel_single(%arg0: i32, %arg1: memref<8x256xf32, #tpu.memory_space<vmem>>, %arg2: memref<8x1xf32, #tpu.memory_space<vmem>>) attributes {dimension_semantics = [#tpu.dimension_semantics<parallel>], iteration_bounds = array<i64: 1>, scalar_prefetch = 0 : i64, scratch_operands = 0 : i64, tpu.core_type = #tpu.core_type<tc>, window_params = [{transform_indices = @transform_0, window_bounds = array<i64: 8, 256>}, {transform_indices = @transform_1, window_bounds = array<i64: 8, 1>}]} {
    %c0 = arith.constant 0 : index
    %c0_0 = arith.constant 0 : index
    %0 = vector.load %arg1[%c0, %c0_0] : memref<8x256xf32, #tpu.memory_space<vmem>>, vector<8x256xf32>
    %cst = arith.constant dense<0.000000e+00> : vector<8xf32>
    %1 = vector.multi_reduction <add>, %0, %cst [1] : vector<8x256xf32> to vector<8xf32>
    %2 = vector.shape_cast %1 : vector<8xf32> to vector<8x1xf32>
    %cst_1 = arith.constant 3.906250e-03 : f32
    %3 = vector.broadcast %cst_1 : f32 to vector<8x1xf32>
    %4 = arith.mulf %2, %3 : vector<8x1xf32>
    %c0_2 = arith.constant 0 : index
    %c0_3 = arith.constant 0 : index
    %5 = vector.load %arg2[%c0_2, %c0_3] : memref<8x1xf32, #tpu.memory_space<vmem>>, vector<8x1xf32>
    tpu.vector_store %arg2[%c0_2, %c0_3], %4 {strides = array<i32>} : memref<8x1xf32, #tpu.memory_space<vmem>>, vector<8x1xf32>,
    return
  }
  func.func @transform_0(%arg0: i32) -> (i32, i32) {
    %c0_i32 = arith.constant 0 : i32
    %c0_i32_0 = arith.constant 0 : i32
    return %arg0, %c0_i32 : i32, i32
  }
  func.func @transform_1(%arg0: i32) -> (i32, i32) {
    %c0_i32 = arith.constant 0 : i32
    %c0_i32_0 = arith.constant 0 : i32
    return %arg0, %c0_i32 : i32, i32
  }
}

</mosaic_0001>

<bundles_post_ra>
// kernel: tpu_custom_call.1
= control target key start
LH: loop header
LB: loop body
LE: loop exit
PB: predicated region body
PF: predicated region fallthrough
CT: control target
= control target key end

     0   :  { %6 = vsyncpa [#allocation3], 0  ;;  %s56_s6 = smov [#allocation2]   ;;  %s73_s0 = inlined_call_operand.hbm [shape: f32[8,256], index: 0, kind: input, shape index: {}]   ;;  %s74_s1 = inlined_call_operand.vmem [shape: f32[8,1], index: 1, kind: output, shape index: {}]  }
   0x1   :  { %s13_s7 = sshll.u32 %s56_s6, 4  ;;  %s14_s7 = int_to_ptr.vmem [resolvable:$true] %s13_s7 }
   0x2   :  { %s42_s8 = scalar_lea.vmem %s14_s7, 256  ;;  %p47_p1 = scmp.lt.s32.totalorder %s14_s7, %s14_s7 }
   0x3   :  { %p43_p0 = scmp.ne.s32.totalorder %s14_s7, %s42_s8  ;;  %p48_p2 = scmp.lt.s32.totalorder %s42_s8, %s42_s8 }
   0x5   :  { %p49_p3 = por %p48_p2, %p47_p1 }
   0x7   :  { %p50_p4 = pnand %p49_p3, %p43_p0 }
   0x9   :  { %53 = shalt.err (!%p50_p4)
}
   0xa   :  { %16 = dma.hbm_to_vmem [thread:$0]  %s73_s0, 256, %s14_s7, [#allocation3]  }
   0xb   :  { %54 = dma.done.wait [#allocation3], 256  }
   0xc   :  { %55 = vsyncadd [#allocation3], 4294967040  ;;  %v20_v0 = vld [vmem:[#allocation2] sm:$0xff]  ;;  %v21_v1 = vld [vmem:[#allocation2 + $0x8] sm:$0xff]  ;;  %vm26_vm0 = vcmask 7168  }
   0xd   :  { %v22_v2 = vadd.f32 %v21_v1, %v20_v0 }
   0xf   :  { %23 = vadd.xlane.f32.xlu0 %v22_v2 }
  0x98   :  { %v24_v3 = vpop.xlane.xlu0 %23 }
  0x99   :  { %v25_v4 = vmul.f32 0.00390625, %v24_v3 }
  0x9b   :  { %27 = vst.msk [vmem:[%s74_s1] sm:$0xff] %vm26_vm0, %v25_v4 }
  0x9c   :  { %32 = vsyncpa [#allocation3], 1 }

</bundles_post_ra>
